<compile_context>
chip_gen: v6e
topology: v6e:2x2x1
jax: 0.10.0
libtpu: 0.0.40
codegen_flags: <defaults>
</compile_context>

<pallas_src>
import jax
import jax.numpy as jnp
from jax.experimental import pallas as pl
from jax.experimental.pallas import tpu as pltpu

SUBLANE = 8


def _round_up(v, m):
    return (v + m - 1) // m * m


def _mxu_multiple():
    """Per-generation batch-tile multiple: v6e/v7x MXU is 256 wide, else 128."""
    try:
        kind = jax.devices()[0].device_kind.lower()
    except Exception:
        return 128
    return 256 if ("v6" in kind or "v7" in kind) else 128


def _pick_tm(batch, block_m):
    """Batch tile size.

    * batch <= MXU width: one small tile (rounded to 8 sublanes only), so a
      tiny batch never pays for a full MXU-width tile of padding.
    * otherwise: tile is a multiple of the MXU width sized ~ceil(batch/2), so
      there are always >= 2 grid steps (v7x can split the "parallel" batch
      axis across its 2 TensorCores) and padding waste is bounded by tm-1
      rows; capped at block_m to amortize the ~0.35us/step grid overhead.
    """
    mult = _mxu_multiple()
    if batch <= mult:
        return _round_up(batch, SUBLANE)
    half = _round_up(-(-batch // 2), mult)
    return int(min(block_m, half))


def _elu_f32(x):
    # ELU with alpha=1.0 (torch.nn.ELU default) in f32; exp rides the
    # otherwise-idle EUP slot.  exp(x)-1 vs expm1 differs by <1.2e-7 for x<=0,
    # well inside f32 tolerance of the torch forward.
    return jnp.where(x > 0, x, jnp.exp(x) - 1.0)


def _mlp_kernel(*refs):
    """refs = (x_ref, w1, b1, w2, b2, ..., wL, bL, o_ref).

    Dropout is the identity at inference, so each hidden stage is
    Linear -> ELU; the last stage is a plain Linear.
    """
    x_ref, o_ref = refs[0], refs[-1]
    param_refs = refs[1:-1]
    n_layers = len(param_refs) // 2

    h = x_ref[...]
    for i in range(n_layers):
        w_ref = param_refs[2 * i]
        b_ref = param_refs[2 * i + 1]
        # bf16 operands on the MXU, f32 accumulation; bias-add / ELU in f32.
        h = jnp.dot(h.astype(w_ref.dtype), w_ref[...],
                    preferred_element_type=jnp.float32)
        h = h + b_ref[...]
        if i < n_layers - 1:
            h = _elu_f32(h)          # Linear -> Dropout(identity) -> ELU
    o_ref[...] = h.astype(o_ref.dtype)


def prepare_params(params):
    """Cast weights to bf16 [fi, fo] and biases to f32 [1, fo].

    No lane padding: the feature dims of this net (16/32/8) stay at their
    natural sizes so no padded bytes are ever streamed to/from HBM.
    """
    prepped = []
    for w, b in params:
        prepped.append((w.astype(jnp.bfloat16),
                        jnp.reshape(b, (1, -1)).astype(jnp.float32)))
    return prepped


def net_forward(x, prepped_params, *, block_m=1024, out_dtype=jnp.float32):
    """Fused MLP forward.

    x: [B, d_in] f32 (passed unpadded / uncast -- bf16 cast happens in-kernel).
    Returns [B, d_out] in out_dtype (pass jnp.bfloat16 to halve the output
    stream if the consumer tolerates it).
    """
    B, d_in = x.shape
    d_out = int(prepped_params[-1][0].shape[1])

    tm = _pick_tm(B, block_m)
    b_pad = _round_up(B, tm)
    grid = (b_pad // tm,)

    # Batch rows are the only padding ever materialized, and only when B is
    # not already a multiple of tm (waste bounded at tm-1 rows of a d_in-wide
    # f32 array).  Feature dims are never padded.
    x_in = x if b_pad == B else jnp.pad(x, ((0, b_pad - B), (0, 0)))

    x_spec = pl.BlockSpec((tm, d_in), lambda i: (i, 0))
    out_spec = pl.BlockSpec((tm, d_out), lambda i: (i, 0))
    # Weights/biases: full-array block with constant index_map -> fetched once
    # and kept VMEM-resident across all grid steps.  (Re-derive against VMEM /
    # scoped limits and move to a K-reduction grid axis + f32 accumulator if
    # hidden dims are scaled to 4k-8k.)
    const = lambda p: pl.BlockSpec(p.shape, lambda i: (0, 0))

    flat_params = [a for wb in prepped_params for a in wb]
    in_specs = [x_spec] + [const(p) for p in flat_params]

    flops = 2 * b_pad * sum(int(w.shape[0]) * int(w.shape[1])
                            for w, _ in prepped_params)
    transcendentals = b_pad * sum(int(w.shape[1])
                                  for w, _ in prepped_params[:-1])
    bytes_accessed = int(
        x_in.size * x_in.dtype.itemsize
        + sum(int(p.size) * p.dtype.itemsize for p in flat_params)
        + b_pad * d_out * jnp.dtype(out_dtype).itemsize)

    out = pl.pallas_call(
        _mlp_kernel,
        out_shape=jax.ShapeDtypeStruct((b_pad, d_out), out_dtype),
        grid=grid,
        in_specs=in_specs,
        out_specs=out_spec,
        compiler_params=pltpu.CompilerParams(
            # Batch axis is embarrassingly parallel; with tm ~ ceil(B/2) the
            # grid has >= 2 steps for large B, so v7x can actually split it
            # across its 2 TensorCores (harmless no-op on v5e/v6e).
            dimension_semantics=("parallel",)),
        cost_estimate=pl.CostEstimate(
            flops=int(flops),
            transcendentals=int(transcendentals),
            bytes_accessed=bytes_accessed),
    )(x_in, *flat_params)

    return out if b_pad == B else out[:B]


def init_params(key, hidden_layers):
    """Deterministic init mimicking nn.Linear's uniform(-1/sqrt(fan_in), 1/sqrt(fan_in))."""
    params = []
    for i in range(len(hidden_layers) - 1):
        fan_in, fan_out = hidden_layers[i], hidden_layers[i + 1]
        key, kw, kb = jax.random.split(key, 3)
        bound = 1.0 / jnp.sqrt(fan_in)
        w = jax.random.uniform(kw, (fan_in, fan_out), jnp.float32, -bound, bound)
        b = jax.random.uniform(kb, (fan_out,), jnp.float32, -bound, bound)
        params.append((w, b))
    return params


if __name__ == "__main__":
    # Net(hidden_layers=[16, 32, 32, 8], dropout=0.1) -> 3 Linear layers,
    # ELU (and inference-identity dropout) after the first two.
    hidden_layers = [16, 32, 32, 8]

    key = jax.random.PRNGKey(0)
    key, kx1, kx2 = jax.random.split(key, 3)
    params = init_params(key, hidden_layers)
    prepped = prepare_params(params)

    # Reference: same forward with the same bf16-operand / f32-accumulate
    # matmuls (plain JAX, no Pallas).
    def ref_forward(x, params):
        h = x
        for i, (w, b) in enumerate(params):
            h = jnp.dot(h.astype(jnp.bfloat16), w.astype(jnp.bfloat16),
                        preferred_element_type=jnp.float32) + b.reshape(1, -1)
            if i < len(params) - 1:
                h = jnp.where(h > 0, h, jnp.exp(h) - 1.0)
        return h

    # Case 1: tiny batch -> single grid step, zero padding, zero slicing.
    x_small = jax.random.normal(kx1, (8, hidden_layers[0]), jnp.float32)
    out_small = net_forward(x_small, prepped)
    jax.block_until_ready(out_small)
    ref_small = ref_forward(x_small, params)
    assert out_small.shape == (8, hidden_layers[-1])
    assert jnp.allclose(out_small, ref_small, atol=1e-3, rtol=1e-3), float(
        jnp.max(jnp.abs(out_small - ref_small)))

    # Case 2: non-aligned mid-size batch -> exercises grid >= 2 (v7x megacore
    # split), bounded batch-row padding, and the remainder slice.
    x_big = jax.random.normal(kx2, (300, hidden_layers[0]), jnp.float32)
    out_big = net_forward(x_big, prepped)
    jax.block_until_ready(out_big)
    ref_big = ref_forward(x_big, params)
    assert out_big.shape == (300, hidden_layers[-1])
    assert jnp.allclose(out_big, ref_big, atol=1e-3, rtol=1e-3), float(
        jnp.max(jnp.abs(out_big - ref_big)))

    print("KERNEL_OK")
</pallas_src>

<mosaic_0001>
module attributes {stable_mosaic.version = 11 : i64} {
  func.func @_mlp_kernel(%arg0: i32, %arg1: memref<8x16xf32, #tpu.memory_space<vmem>>, %arg2: memref<16x32xbf16, #tpu.memory_space<vmem>>, %arg3: memref<1x32xf32, #tpu.memory_space<vmem>>, %arg4: memref<32x32xbf16, #tpu.memory_space<vmem>>, %arg5: memref<1x32xf32, #tpu.memory_space<vmem>>, %arg6: memref<32x8xbf16, #tpu.memory_space<vmem>>, %arg7: memref<1x8xf32, #tpu.memory_space<vmem>>, %arg8: memref<8x8xf32, #tpu.memory_space<vmem>>) attributes {dimension_semantics = [#tpu.dimension_semantics<parallel>], iteration_bounds = array<i64: 1>, scalar_prefetch = 0 : i64, scratch_operands = 0 : i64, tpu.core_type = #tpu.core_type<tc>, window_params = [{transform_indices = @transform_0, window_bounds = array<i64: 8, 16>}, {pipeline_mode = #tpu.pipeline_mode<synchronous>, transform_indices = @transform_1, window_bounds = array<i64: 16, 32>}, {pipeline_mode = #tpu.pipeline_mode<synchronous>, transform_indices = @transform_2, window_bounds = array<i64: 1, 32>}, {pipeline_mode = #tpu.pipeline_mode<synchronous>, transform_indices = @transform_3, window_bounds = array<i64: 32, 32>}, {pipeline_mode = #tpu.pipeline_mode<synchronous>, transform_indices = @transform_4, window_bounds = array<i64: 1, 32>}, {pipeline_mode = #tpu.pipeline_mode<synchronous>, transform_indices = @transform_5, window_bounds = array<i64: 32, 8>}, {pipeline_mode = #tpu.pipeline_mode<synchronous>, transform_indices = @transform_6, window_bounds = array<i64: 1, 8>}, {transform_indices = @transform_7, window_bounds = array<i64: 8, 8>}]} {
    %c0 = arith.constant 0 : index
    %c0_0 = arith.constant 0 : index
    %0 = vector.load %arg1[%c0, %c0_0] : memref<8x16xf32, #tpu.memory_space<vmem>>, vector<8x16xf32>
    %1 = arith.truncf %0 : vector<8x16xf32> to vector<8x16xbf16>
    %c0_1 = arith.constant 0 : index
    %c0_2 = arith.constant 0 : index
    %2 = vector.load %arg2[%c0_1, %c0_2] : memref<16x32xbf16, #tpu.memory_space<vmem>>, vector<16x32xbf16>
    %cst = arith.constant dense<0.000000e+00> : vector<8x32xf32>
    %3 = tpu.matmul %1, %2, %cst {dimension_numbers = #tpu.dot_dimension_numbers<[1], [0], [0], [1], [0, 0, 1, 1], [], []>} : vector<8x16xbf16>, vector<16x32xbf16>, vector<8x32xf32> -> vector<8x32xf32>
    %c0_3 = arith.constant 0 : index
    %c0_4 = arith.constant 0 : index
    %4 = vector.load %arg3[%c0_3, %c0_4] : memref<1x32xf32, #tpu.memory_space<vmem>>, vector<1x32xf32>
    %5 = vector.broadcast %4 : vector<1x32xf32> to vector<8x32xf32>
    %6 = arith.addf %3, %5 : vector<8x32xf32>
    %cst_5 = arith.constant 0.000000e+00 : f32
    %7 = vector.broadcast %cst_5 : f32 to vector<8x32xf32>
    %8 = arith.cmpf ogt, %6, %7 : vector<8x32xf32>
    %9 = math.exp %6 : vector<8x32xf32>
    %cst_6 = arith.constant 1.000000e+00 : f32
    %10 = vector.broadcast %cst_6 : f32 to vector<8x32xf32>
    %11 = arith.subf %9, %10 : vector<8x32xf32>
    %12 = arith.select %8, %6, %11 : vector<8x32xi1>, vector<8x32xf32>
    %13 = arith.truncf %12 : vector<8x32xf32> to vector<8x32xbf16>
    %c0_7 = arith.constant 0 : index
    %c0_8 = arith.constant 0 : index
    %14 = vector.load %arg4[%c0_7, %c0_8] : memref<32x32xbf16, #tpu.memory_space<vmem>>, vector<32x32xbf16>
    %cst_9 = arith.constant dense<0.000000e+00> : vector<8x32xf32>
    %15 = tpu.matmul %13, %14, %cst_9 {dimension_numbers = #tpu.dot_dimension_numbers<[1], [0], [0], [1], [0, 0, 1, 1], [], []>} : vector<8x32xbf16>, vector<32x32xbf16>, vector<8x32xf32> -> vector<8x32xf32>
    %c0_10 = arith.constant 0 : index
    %c0_11 = arith.constant 0 : index
    %16 = vector.load %arg5[%c0_10, %c0_11] : memref<1x32xf32, #tpu.memory_space<vmem>>, vector<1x32xf32>
    %17 = vector.broadcast %16 : vector<1x32xf32> to vector<8x32xf32>
    %18 = arith.addf %15, %17 : vector<8x32xf32>
    %cst_12 = arith.constant 0.000000e+00 : f32
    %19 = vector.broadcast %cst_12 : f32 to vector<8x32xf32>
    %20 = arith.cmpf ogt, %18, %19 : vector<8x32xf32>
    %21 = math.exp %18 : vector<8x32xf32>
    %cst_13 = arith.constant 1.000000e+00 : f32
    %22 = vector.broadcast %cst_13 : f32 to vector<8x32xf32>
    %23 = arith.subf %21, %22 : vector<8x32xf32>
    %24 = arith.select %20, %18, %23 : vector<8x32xi1>, vector<8x32xf32>
    %25 = arith.truncf %24 : vector<8x32xf32> to vector<8x32xbf16>
    %c0_14 = arith.constant 0 : index
    %c0_15 = arith.constant 0 : index
    %26 = vector.load %arg6[%c0_14, %c0_15] : memref<32x8xbf16, #tpu.memory_space<vmem>>, vector<32x8xbf16>
    %cst_16 = arith.constant dense<0.000000e+00> : vector<8x8xf32>
    %27 = tpu.matmul %25, %26, %cst_16 {dimension_numbers = #tpu.dot_dimension_numbers<[1], [0], [0], [1], [0, 0, 1, 1], [], []>} : vector<8x32xbf16>, vector<32x8xbf16>, vector<8x8xf32> -> vector<8x8xf32>
    %c0_17 = arith.constant 0 : index
    %c0_18 = arith.constant 0 : index
    %28 = vector.load %arg7[%c0_17, %c0_18] : memref<1x8xf32, #tpu.memory_space<vmem>>, vector<1x8xf32>
    %29 = vector.broadcast %28 : vector<1x8xf32> to vector<8x8xf32>
    %30 = arith.addf %27, %29 : vector<8x8xf32>
    %c0_19 = arith.constant 0 : index
    %c0_20 = arith.constant 0 : index
    %31 = vector.load %arg8[%c0_19, %c0_20] : memref<8x8xf32, #tpu.memory_space<vmem>>, vector<8x8xf32>
    tpu.vector_store %arg8[%c0_19, %c0_20], %30 {strides = array<i32>} : memref<8x8xf32, #tpu.memory_space<vmem>>, vector<8x8xf32>,
    return
  }
  func.func @transform_0(%arg0: i32) -> (i32, i32) {
    %c0_i32 = arith.constant 0 : i32
    %c0_i32_0 = arith.constant 0 : i32
    return %arg0, %c0_i32 : i32, i32
  }
  func.func @transform_1(%arg0: i32) -> (i32, i32) {
    %c0_i32 = arith.constant 0 : i32
    %c0_i32_0 = arith.constant 0 : i32
    %c0_i32_1 = arith.constant 0 : i32
    return %c0_i32, %c0_i32_0 : i32, i32
  }
  func.func @transform_2(%arg0: i32) -> (i32, i32) {
    %c0_i32 = arith.constant 0 : i32
    %c0_i32_0 = arith.constant 0 : i32
    %c0_i32_1 = arith.constant 0 : i32
    return %c0_i32, %c0_i32_0 : i32, i32
  }
  func.func @transform_3(%arg0: i32) -> (i32, i32) {
    %c0_i32 = arith.constant 0 : i32
    %c0_i32_0 = arith.constant 0 : i32
    %c0_i32_1 = arith.constant 0 : i32
    return %c0_i32, %c0_i32_0 : i32, i32
  }
  func.func @transform_4(%arg0: i32) -> (i32, i32) {
    %c0_i32 = arith.constant 0 : i32
    %c0_i32_0 = arith.constant 0 : i32
    %c0_i32_1 = arith.constant 0 : i32
    return %c0_i32, %c0_i32_0 : i32, i32
  }
  func.func @transform_5(%arg0: i32) -> (i32, i32) {
    %c0_i32 = arith.constant 0 : i32
    %c0_i32_0 = arith.constant 0 : i32
    %c0_i32_1 = arith.constant 0 : i32
    return %c0_i32, %c0_i32_0 : i32, i32
  }
  func.func @transform_6(%arg0: i32) -> (i32, i32) {
    %c0_i32 = arith.constant 0 : i32
    %c0_i32_0 = arith.constant 0 : i32
    %c0_i32_1 = arith.constant 0 : i32
    return %c0_i32, %c0_i32_0 : i32, i32
  }
  func.func @transform_7(%arg0: i32) -> (i32, i32) {
    %c0_i32 = arith.constant 0 : i32
    %c0_i32_0 = arith.constant 0 : i32
    return %arg0, %c0_i32 : i32, i32
  }
}

</mosaic_0001>

<bundles_post_ra>
// kernel: tpu_custom_call.1
= control target key start
LH: loop header
LB: loop body
LE: loop exit
PB: predicated region body
PF: predicated region fallthrough
CT: control target
= control target key end

     0   :  { %12 = vsyncpa [#allocation3], 0  ;;  %s482_s0 = inlined_call_operand.vmem [shape: f32[8,16], index: 0, kind: input, shape index: {}]   ;;  %s483_s1 = inlined_call_operand.hbm [shape: bf16[16,32], index: 1, kind: input, shape index: {}]   ;;  %s484_s2 = inlined_call_operand.vmem [shape: f32[1,32], index: 2, kind: input, shape index: {}]   ;;  %s485_s3 = inlined_call_operand.vmem [shape: bf16[32,32], index: 3, kind: input, shape index: {}]   ;;  %s486_s4 = inlined_call_operand.hbm [shape: f32[1,32], index: 4, kind: input, shape index: {}]   ;;  %s487_s5 = inlined_call_operand.vmem [shape: bf16[32,8], index: 5, kind: input, shape index: {}]   ;;  %s488_s6 = inlined_call_operand.vmem [shape: f32[1,8], index: 6, kind: input, shape index: {}]   ;;  %s489_s7 = inlined_call_operand.hbm [shape: f32[8,8], index: 7, kind: output, shape index: {}]  }
   0x1   :  { %13 = vsyncpa [#allocation6], 0 }
   0x2   :  { %14 = vsyncpa [#allocation4], 0  ;;  %s403_s24 = smov [#allocation2]  }
   0x3   :  { %s22_s25 = sshll.u32 %s403_s24, 4  ;;  %s23_s25 = int_to_ptr.vmem [resolvable:$true] %s22_s25 }
   0x4   :  { %s345_s26 = scalar_lea.vmem %s23_s25, 128  ;;  %p350_p1 = scmp.lt.s32.totalorder %s23_s25, %s23_s25 }
   0x5   :  { %p346_p0 = scmp.ne.s32.totalorder %s23_s25, %s345_s26  ;;  %p351_p2 = scmp.lt.s32.totalorder %s345_s26, %s345_s26 }
   0x7   :  { %p352_p3 = por %p351_p2, %p350_p1 }
   0x9   :  { %p353_p4 = pnand %p352_p3, %p346_p0 }
   0xb   :  { %356 = shalt.err (!%p353_p4)
}
   0xc   :  { %s404_s27 = smov 64   ;;  %s405_s28 = smov 4  }
   0xd   :  { %28 = dma.hbm_to_vmem [thread:$0]  %s483_s1, 128, %s23_s25, [#allocation3], %s404_s27, %s404_s27, %s405_s28  }
   0xe   :  { %s406_s8 = smov [#allocation5]  }
   0xf   :  { %s39_s9 = sshll.u32 %s406_s8, 4  ;;  %s40_s9 = int_to_ptr.vmem [resolvable:$true] %s39_s9 }
  0x10   :  { %s365_s10 = scalar_lea.vmem %s40_s9, 16  ;;  %s369_s11 = scalar_lea.vmem %s40_s9, 32 }
  0x11   :  { %p366_p5 = scmp.ne.s32.totalorder %s40_s9, %s365_s10  ;;  %p370_p6 = scmp.lt.s32.totalorder %s40_s9, %s40_s9 }
  0x12   :  { %p371_p7 = scmp.lt.s32.totalorder %s369_s11, %s365_s10 }
  0x14   :  { %p372_p8 = por %p371_p7, %p370_p6 }
  0x16   :  { %p373_p9 = pnand %p372_p8, %p366_p5 }
  0x18   :  { %376 = shalt.err (!%p373_p9)
}
  0x19   :  { %42 = dma.hbm_to_vmem [thread:$0]  %s486_s4, 16, %s40_s9, [#allocation6]  }
  0x1a   :  { %397 = dma.done.wait [#allocation3], 128  }
  0x1b   :  { %398 = vsyncadd [#allocation3], 4294967168 }
  0x1c   :  { %399 = dma.done.wait [#allocation6], 16  }
  0x1d   :  { %400 = vsyncadd [#allocation6], 4294967280  ;;  %v407_v0 = vmov 0.0   ;;  %vm408_vm0 = vmmov 0   ;;  %v328_v1 = vld [vmem:[#allocation2] sm:$0xff]   ;;  %vm71_vm1 = vcmask 130048  }
  0x1e   :  { %299 = vmatprep.subr.bf16.mxu0 %v407_v0  ;;  %301 = vmatprep.mubr.msk.bf16.mxu0 %vm408_vm0, %v407_v0  ;;  %v54_v2 = vld [vmem:[%s482_s0] sm:$0xff]  ;;  %v329_v4 = vld [vmem:[%s485_s3 + $0x8] sm:$0xff]   ;;  %vm144_vm3 = vcmask 261120   ;;  %vm260_vm5 = vcmask 64512  }
  0x1f   :  { %305 = vmatprep.subr.bf16.mxu1 %v407_v0  ;;  %309 = vmatprep.mubr.msk.bf16.mxu1 %vm408_vm0, %v407_v0  ;;  %v55_v3 = vpack.c.bf16 %v54_v2, %v54_v2  ;;  %v330_v5 = vld [vmem:[%s485_s3] sm:$0xff]   ;;  %v331_v17 = vld [vmem:[%s487_s5 + $0x8] sm:$0xff]  }
  0x20   :  { %300 = vmatpush3.bf16.msra.mxu0 %v328_v1  ;;  %306 = vmatpush3.bf16.msra.mxu1 %v329_v4  ;;  %v278_v6 = vld [vmem:[%s484_s2] ss:$0 sm:$0xff]  ;;  %v282_v19 = vld [vmem:[#allocation5] ss:$0 sm:$0xff] }
  0x21   :  { %313 = vmatprep.subr.bf16.mxu0 %v407_v0  ;;  %307 = vmatprep.subr.bf16.mxu1 %v407_v0  ;;  %v332_v18 = vld [vmem:[%s487_s5] sm:$0xff]   ;;  %s409_s5 = smov [#allocation7]  }
  0x22   :  { %v287_v30 = vld [vmem:[%s488_s6] ss:$0 sm:$0xff]  ;;  %s268_s23 = sshll.u32 %s409_s5, 4  ;;  %s269_s23 = int_to_ptr.vmem [resolvable:$true] %s268_s23 }
  0x23   :  { %302 = vmatmul.mubr.msk.bf16.vlgmr.msra.gmra.mxu0 %vm71_vm1, %v55_v3  ;;  %s377_s24 = scalar_lea.vmem %s269_s23, 128  ;;  %p382_p11 = scmp.lt.s32.totalorder %s269_s23, %s269_s23 }
  0x24   :  { %317 = vmatprep.mubr.msk.bf16.mxu0 %vm408_vm0, %v407_v0  ;;  %308 = vmatpush3.bf16.msra.mxu1 %v330_v5  ;;  %p378_p10 = scmp.ne.s32.totalorder %s269_s23, %s377_s24  ;;  %p383_p12 = scmp.lt.s32.totalorder %s377_s24, %s377_s24 }
  0x25   :  { %314 = vmatpush3.bf16.msra.mxu0 %v331_v17 }
  0x26   :  { %315 = vmatprep.subr.bf16.mxu0 %v407_v0  ;;  %p384_p13 = por %p383_p12, %p382_p11 }
  0x28   :  { %p385_p0 = pnand %p384_p13, %p378_p10 }
  0x29   :  { %316 = vmatpush3.bf16.msra.mxu0 %v332_v18 }
  0xe3   :  { %v109_v7 = vpop.f32.mrf.mxu0 }
  0xe4   :  { %v110_v8 = vadd.f32 %v278_v6, %v109_v7 }
  0xe5   :  { %v303_v9 = vpop.f32.mrf.mxu0 }
  0xe6   :  { %v116_v10 = vmul.f32 1.442695, %v110_v8  ;;  %vm115_vm2 = vcmp.gt.f32.partialorder %v110_v8, 0.0 }
  0xe7   :  { %v112_v11 = vpop.f32.mrf.mxu0 }
  0xe8   :  { %333 = vpow2.f32 %v116_v10 }
  0xe9   :  { %v304_v12 = vpop.f32.mrf.mxu0 }
  0xf5   :  { %v334_v13 = vpop.eup %333 }
  0xf6   :  { %v281_v14 = vadd.f32 -1.0, %v334_v13 }
  0xf8   :  { %v119_v15 = vsel %vm115_vm2, %v110_v8, %v281_v14 }
  0xf9   :  { %v120_v16 = vpack.c.bf16 %v119_v15, %v119_v15 }
  0xfb   :  { %310 = vmatmul.mubr.msk.bf16.vlgmr.msra.gmra.mxu1 %vm144_vm3, %v120_v16 }
 0x1bb   :  { %v182_v20 = vpop.f32.mrf.mxu1 }
 0x1bc   :  { %v183_v21 = vadd.f32 %v282_v19, %v182_v20 }
 0x1bd   :  { %v311_v22 = vpop.f32.mrf.mxu1 }
 0x1be   :  { %v189_v23 = vmul.f32 1.442695, %v183_v21  ;;  %vm188_vm4 = vcmp.gt.f32.partialorder %v183_v21, 0.0 }
 0x1bf   :  { %v185_v24 = vpop.f32.mrf.mxu1 }
 0x1c0   :  { %335 = vpow2.f32 %v189_v23 }
 0x1c1   :  { %v312_v25 = vpop.f32.mrf.mxu1 }
 0x1cd   :  { %v336_v26 = vpop.eup %335 }
 0x1ce   :  { %v286_v27 = vadd.f32 -1.0, %v336_v26 }
 0x1d0   :  { %v192_v28 = vsel %vm188_vm4, %v183_v21, %v286_v27 }
 0x1d1   :  { %v193_v29 = vpack.c.bf16 %v192_v28, %v192_v28 }
 0x1d3   :  { %318 = vmatmul.mubr.msk.bf16.vlgmr.msra.gmra.mxu0 %vm144_vm3, %v193_v29 }
 0x293   :  { %v254_v31 = vpop.f32.mrf.mxu0 }
 0x294   :  { %v255_v32 = vadd.f32 %v287_v30, %v254_v31 }
 0x295   :  { %v319_v33 = vpop.f32.mrf.mxu0 }
 0x296   :  { %261 = vst.msk [vmem:[#allocation7] sm:$0xff] %vm260_vm5, %v255_v32 }
 0x297   :  { %v257_v34 = vpop.f32.mrf.mxu0 }
 0x298   :  { %388 = shalt.err (!%p385_p0)
}
 0x299   :  { %271 = dma.vmem_to_hbm [thread:$0]  %s269_s23, 128, %s489_s7, [#allocation4]   ;;  %v320_v35 = vpop.f32.mrf.mxu0 }
 0x29a   :  { %401 = dma.done.wait [#allocation4], 128  }
 0x29b   :  { %402 = vsyncadd [#allocation4], 4294967168 }
 0x29c   :  { %275 = vsyncpa [#allocation3], 1 }
 0x29d   :  { %276 = vsyncpa [#allocation6], 1 }
 0x29e   :  { %277 = vsyncpa [#allocation4], 1 }

</bundles_post_ra>
